<compile_context>
chip_gen: v6e
topology: v6e:2x2x1
jax: 0.10.0
libtpu: 0.0.40
codegen_flags: <defaults>
</compile_context>

<pallas_src>
import jax
import jax.numpy as jnp
from jax import lax
from jax.experimental import pallas as pl
from jax.experimental.pallas import tpu as pltpu


def _round_up(n, m):
    return -(-n // m) * m


def _mlp_kernel(x_ref, y_ref, w1_ref, w2_ref, o_ref):
    # x_ref: [tile_b, dim1], w1_ref: [out_dim, dim1]  -> contract last dims
    # (MXU consumes the transposed operand natively; no VMEM transpose op).
    acc = lax.dot_general(
        x_ref[...], w1_ref[...],
        dimension_numbers=(((1,), (1,)), ((), ())),
        preferred_element_type=jnp.float32,
    )
    acc = acc + lax.dot_general(
        y_ref[...], w2_ref[...],
        dimension_numbers=(((1,), (1,)), ((), ())),
        preferred_element_type=jnp.float32,
    )
    o_ref[...] = jnp.maximum(acc, 0.0).astype(o_ref.dtype)


def _vmem_budget_bytes():
    """Per-generation (budget for tile sizing, scoped vmem limit) in bytes."""
    cap = None
    try:
        info = pltpu.get_tpu_info()
        cap = getattr(info, "vmem_capacity_bytes", None)
    except Exception:
        cap = None
    if cap is not None and cap >= 128 * 1024 * 1024:
        # v5e / v6e: 128 MiB physical VMEM -> generous budget, fewer grid steps.
        return 48 * 1024 * 1024, 64 * 1024 * 1024
    # v7x (64 MiB physical / 32 MiB scoped default) or unknown: stay conservative.
    return 24 * 1024 * 1024, 48 * 1024 * 1024


def _select_tile_b(batch, dim1, dim2, out_dim, itemsize, *, target, budget_bytes):
    """Largest 8-aligned batch tile <= target whose pipelined blocks fit the budget."""
    b_aligned = _round_up(batch, 8)

    # Double-buffered x / y / out row tiles + resident weights (2x headroom).
    per_row = 2 * (dim1 + dim2 + out_dim) * itemsize
    weights = 2 * (dim1 + dim2) * out_dim * itemsize
    avail = max(budget_bytes - weights, per_row * 8)  # may exceed budget for huge K*N;
    max_rows = max(8, (avail // per_row // 8) * 8)    # vmem_limit_bytes is the backstop.

    tile = min(max(8, (target // 8) * 8), max_rows, b_aligned)
    tile = max(8, (tile // 8) * 8)

    # v7x megacore: keep >= 2 "parallel" grid steps once each half-tile is
    # still large enough (>= 512 rows) to sit near the HBM roofline.
    if b_aligned >= 2 * 512:
        half = _round_up(-(-b_aligned // 2), 8)
        tile = min(tile, half)
    return tile


def multi_input_arg_mlp(x, y, w1, w2, *, tile_b=4096, compute_dtype=None):
    """x: [B, dim1], y: [B, dim2], w1: [out_dim, dim1], w2: [out_dim, dim2]."""
    B, dim1 = x.shape
    By, dim2 = y.shape
    out_dim = w1.shape[0]
    assert By == B
    assert w1.shape == (out_dim, dim1)
    assert w2.shape == (out_dim, dim2)

    out_dtype = x.dtype
    if compute_dtype is not None:
        # bf16 (or other) compute path: halves HBM traffic, keeps f32 accumulation.
        x = x.astype(compute_dtype)
        y = y.astype(compute_dtype)
        w1 = w1.astype(compute_dtype)
        w2 = w2.astype(compute_dtype)

    itemsize = max(jnp.dtype(x.dtype).itemsize, jnp.dtype(y.dtype).itemsize)
    budget_bytes, vmem_limit = _vmem_budget_bytes()
    tile_b = _select_tile_b(
        B, dim1, dim2, out_dim, itemsize, target=tile_b, budget_bytes=budget_bytes
    )

    grid = (pl.cdiv(B, tile_b),)  # OOB rows of the last block are dropped on store.

    out = pl.pallas_call(
        _mlp_kernel,
        out_shape=jax.ShapeDtypeStruct((B, out_dim), out_dtype),
        grid=grid,
        in_specs=[
            pl.BlockSpec((tile_b, dim1), lambda i: (i, 0)),   # x batch tile
            pl.BlockSpec((tile_b, dim2), lambda i: (i, 0)),   # y batch tile
            pl.BlockSpec((out_dim, dim1), lambda i: (0, 0)),  # resident W1
            pl.BlockSpec((out_dim, dim2), lambda i: (0, 0)),  # resident W2
        ],
        out_specs=pl.BlockSpec((tile_b, out_dim), lambda i: (i, 0)),
        compiler_params=pltpu.CompilerParams(
            # Independent batch tiles -> shard grid across TCs (v7x megacore).
            dimension_semantics=("parallel",),
            vmem_limit_bytes=vmem_limit,
        ),
    )(x, y, w1, w2)

    return out


def reference(x, y, w1, w2):
    return jnp.maximum(x @ w1.T + y @ w2.T, 0.0)


if __name__ == "__main__":
    # Small shapes consistent with the module: two inputs of different widths.
    B, dim1, dim2, out_dim = 8, 32, 16, 128

    key = jax.random.PRNGKey(0)
    kx, ky, kw1, kw2 = jax.random.split(key, 4)

    x = jax.random.normal(kx, (B, dim1), dtype=jnp.float32)
    y = jax.random.normal(ky, (B, dim2), dtype=jnp.float32)

    # Deterministic "Linear" weights (nn.Linear stores [out_dim, in_dim]).
    w1 = jax.random.normal(kw1, (out_dim, dim1), dtype=jnp.float32) * (1.0 / dim1 ** 0.5)
    w2 = jax.random.normal(kw2, (out_dim, dim2), dtype=jnp.float32) * (1.0 / dim2 ** 0.5)

    out = multi_input_arg_mlp(x, y, w1, w2)
    out = jax.block_until_ready(out)

    ref = reference(x, y, w1, w2)
    assert out.shape == (B, out_dim)
    assert jnp.allclose(out, ref, atol=1e-5, rtol=1e-5)

    print("KERNEL_OK")
</pallas_src>

<mosaic_0001>
module attributes {stable_mosaic.version = 11 : i64} {
  func.func @_mlp_kernel(%arg0: i32, %arg1: memref<8x32xf32, #tpu.memory_space<vmem>>, %arg2: memref<8x16xf32, #tpu.memory_space<vmem>>, %arg3: memref<128x32xf32, #tpu.memory_space<vmem>>, %arg4: memref<128x16xf32, #tpu.memory_space<vmem>>, %arg5: memref<8x128xf32, #tpu.memory_space<vmem>>) attributes {dimension_semantics = [#tpu.dimension_semantics<parallel>], iteration_bounds = array<i64: 1>, scalar_prefetch = 0 : i64, scratch_operands = 0 : i64, tpu.core_type = #tpu.core_type<tc>, window_params = [{transform_indices = @transform_0, window_bounds = array<i64: 8, 32>}, {transform_indices = @transform_1, window_bounds = array<i64: 8, 16>}, {pipeline_mode = #tpu.pipeline_mode<synchronous>, transform_indices = @transform_2, window_bounds = array<i64: 128, 32>}, {pipeline_mode = #tpu.pipeline_mode<synchronous>, transform_indices = @transform_3, window_bounds = array<i64: 128, 16>}, {transform_indices = @transform_4, window_bounds = array<i64: 8, 128>}]} {
    %c0 = arith.constant 0 : index
    %c0_0 = arith.constant 0 : index
    %0 = vector.load %arg1[%c0, %c0_0] : memref<8x32xf32, #tpu.memory_space<vmem>>, vector<8x32xf32>
    %c0_1 = arith.constant 0 : index
    %c0_2 = arith.constant 0 : index
    %1 = vector.load %arg3[%c0_1, %c0_2] : memref<128x32xf32, #tpu.memory_space<vmem>>, vector<128x32xf32>
    %cst = arith.constant dense<0.000000e+00> : vector<8x128xf32>
    %2 = tpu.matmul %0, %1, %cst {dimension_numbers = #tpu.dot_dimension_numbers<[1], [1], [0], [0], [0, 0, 1, 0], [], []>} : vector<8x32xf32>, vector<128x32xf32>, vector<8x128xf32> -> vector<8x128xf32>
    %c0_3 = arith.constant 0 : index
    %c0_4 = arith.constant 0 : index
    %3 = vector.load %arg2[%c0_3, %c0_4] : memref<8x16xf32, #tpu.memory_space<vmem>>, vector<8x16xf32>
    %c0_5 = arith.constant 0 : index
    %c0_6 = arith.constant 0 : index
    %4 = vector.load %arg4[%c0_5, %c0_6] : memref<128x16xf32, #tpu.memory_space<vmem>>, vector<128x16xf32>
    %cst_7 = arith.constant dense<0.000000e+00> : vector<8x128xf32>
    %5 = tpu.matmul %3, %4, %cst_7 {dimension_numbers = #tpu.dot_dimension_numbers<[1], [1], [0], [0], [0, 0, 1, 0], [], []>} : vector<8x16xf32>, vector<128x16xf32>, vector<8x128xf32> -> vector<8x128xf32>
    %6 = arith.addf %2, %5 : vector<8x128xf32>
    %cst_8 = arith.constant 0.000000e+00 : f32
    %7 = vector.broadcast %cst_8 : f32 to vector<8x128xf32>
    %8 = arith.maximumf %6, %7 : vector<8x128xf32>
    %c0_9 = arith.constant 0 : index
    %c0_10 = arith.constant 0 : index
    %9 = vector.load %arg5[%c0_9, %c0_10] : memref<8x128xf32, #tpu.memory_space<vmem>>, vector<8x128xf32>
    tpu.vector_store %arg5[%c0_9, %c0_10], %8 {strides = array<i32>} : memref<8x128xf32, #tpu.memory_space<vmem>>, vector<8x128xf32>,
    return
  }
  func.func @transform_0(%arg0: i32) -> (i32, i32) {
    %c0_i32 = arith.constant 0 : i32
    %c0_i32_0 = arith.constant 0 : i32
    return %arg0, %c0_i32 : i32, i32
  }
  func.func @transform_1(%arg0: i32) -> (i32, i32) {
    %c0_i32 = arith.constant 0 : i32
    %c0_i32_0 = arith.constant 0 : i32
    return %arg0, %c0_i32 : i32, i32
  }
  func.func @transform_2(%arg0: i32) -> (i32, i32) {
    %c0_i32 = arith.constant 0 : i32
    %c0_i32_0 = arith.constant 0 : i32
    %c0_i32_1 = arith.constant 0 : i32
    return %c0_i32, %c0_i32_0 : i32, i32
  }
  func.func @transform_3(%arg0: i32) -> (i32, i32) {
    %c0_i32 = arith.constant 0 : i32
    %c0_i32_0 = arith.constant 0 : i32
    %c0_i32_1 = arith.constant 0 : i32
    return %c0_i32, %c0_i32_0 : i32, i32
  }
  func.func @transform_4(%arg0: i32) -> (i32, i32) {
    %c0_i32 = arith.constant 0 : i32
    %c0_i32_0 = arith.constant 0 : i32
    return %arg0, %c0_i32 : i32, i32
  }
}

</mosaic_0001>

<bundles_post_ra>
// kernel: tpu_custom_call.1
= control target key start
LH: loop header
LB: loop body
LE: loop exit
PB: predicated region body
PF: predicated region fallthrough
CT: control target
= control target key end

     0   :  { %vm52_vm0 = vcmask 130048   ;;  %vm174_vm1 = vcmask 261120   ;;  %v475_v2 = vmov 0.0   ;;  %vm476_vm2 = vmmov 0   ;;  %s676_s0 = inlined_call_operand.vmem [shape: f32[8,32], index: 0, kind: input, shape index: {}]   ;;  %s677_s1 = inlined_call_operand.vmem [shape: f32[8,16], index: 1, kind: input, shape index: {}]   ;;  %s678_s2 = inlined_call_operand.vmem [shape: f32[128,32], index: 2, kind: input, shape index: {}]   ;;  %s679_s3 = inlined_call_operand.vmem [shape: f32[128,16], index: 3, kind: input, shape index: {}]   ;;  %s680_s4 = inlined_call_operand.hbm [shape: f32[8,128], index: 4, kind: output, shape index: {}]  }
   0x1   :  { %v51_v0 = vld [vmem:[%s679_s3 + $0x78] sm:$0xff]  ;;  %380 = vmatprep.subr.mxu0 %v475_v2  ;;  %415 = vmatprep.subr.mxu1 %v475_v2  ;;  %v50_v3 = vld [vmem:[%s679_s3 + $0x70] sm:$0xff]  ;;  %v49_v5 = vld [vmem:[%s679_s3 + $0x68] sm:$0xff] }
   0x2   :  { %v34_v1 = vld [vmem:[%s678_s2 + $0x78] sm:$0xff]  ;;  %381 = vmatpush3.xpose.msk.msra.mxu0 %vm52_vm0, %v51_v0  ;;  %v33_v4 = vld [vmem:[%s678_s2 + $0x70] sm:$0xff]  ;;  %412 = vmatprep.mubr.msk.f32.mxu0 %vm476_vm2, %v475_v2  ;;  %v32_v6 = vld [vmem:[%s678_s2 + $0x68] sm:$0xff] }
   0x3   :  { %416 = vmatpush3.xpose.msk.msra.mxu1 %vm174_vm1, %v34_v1  ;;  %382 = vmatprep.subr.mxu0 %v475_v2  ;;  %v48_v7 = vld [vmem:[%s679_s3 + $0x60] sm:$0xff] }
   0x4   :  { %417 = vmatprep.subr.mxu1 %v475_v2  ;;  %447 = vmatprep.mubr.msk.f32.mxu1 %vm476_vm2, %v475_v2  ;;  %v31_v8 = vld [vmem:[%s678_s2 + $0x60] sm:$0xff] }
   0x6   :  { %383 = vmatpush3.xpose.msk.msra.mxu0 %vm52_vm0, %v50_v3 }
   0x7   :  { %418 = vmatpush3.xpose.msk.msra.mxu1 %vm174_vm1, %v33_v4  ;;  %384 = vmatprep.subr.mxu0 %v475_v2 }
   0x8   :  { %419 = vmatprep.subr.mxu1 %v475_v2 }
   0xa   :  { %385 = vmatpush3.xpose.msk.msra.mxu0 %vm52_vm0, %v49_v5 }
   0xb   :  { %420 = vmatpush3.xpose.msk.msra.mxu1 %vm174_vm1, %v32_v6  ;;  %386 = vmatprep.subr.mxu0 %v475_v2 }
   0xc   :  { %421 = vmatprep.subr.mxu1 %v475_v2 }
   0xd   :  { %9 = vsyncpa [#allocation3], 0  ;;  %v47_v9 = vld [vmem:[%s679_s3 + $0x58] sm:$0xff]  ;;  %v46_v11 = vld [vmem:[%s679_s3 + $0x50] sm:$0xff] }
   0xe   :  { %387 = vmatpush3.xpose.msk.msra.mxu0 %vm52_vm0, %v48_v7  ;;  %v30_v10 = vld [vmem:[%s678_s2 + $0x58] sm:$0xff]  ;;  %v29_v12 = vld [vmem:[%s678_s2 + $0x50] sm:$0xff]  ;;  %v45_v13 = vld [vmem:[%s679_s3 + $0x48] sm:$0xff] }
   0xf   :  { %422 = vmatpush3.xpose.msk.msra.mxu1 %vm174_vm1, %v31_v8  ;;  %388 = vmatprep.subr.mxu0 %v475_v2  ;;  %v28_v14 = vld [vmem:[%s678_s2 + $0x48] sm:$0xff]  ;;  %v44_v15 = vld [vmem:[%s679_s3 + $0x40] sm:$0xff]  ;;  %v43_v17 = vld [vmem:[%s679_s3 + $0x38] sm:$0xff] }
  0x10   :  { %423 = vmatprep.subr.mxu1 %v475_v2  ;;  %v27_v16 = vld [vmem:[%s678_s2 + $0x40] sm:$0xff]  ;;  %v26_v18 = vld [vmem:[%s678_s2 + $0x38] sm:$0xff]  ;;  %v42_v19 = vld [vmem:[%s679_s3 + $0x30] sm:$0xff] }
  0x11   :  { %v25_v20 = vld [vmem:[%s678_s2 + $0x30] sm:$0xff]  ;;  %v41_v21 = vld [vmem:[%s679_s3 + $0x28] sm:$0xff]  ;;  %v40_v23 = vld [vmem:[%s679_s3 + $0x20] sm:$0xff] }
  0x12   :  { %389 = vmatpush3.xpose.msk.msra.mxu0 %vm52_vm0, %v47_v9  ;;  %v24_v22 = vld [vmem:[%s678_s2 + $0x28] sm:$0xff]  ;;  %v23_v24 = vld [vmem:[%s678_s2 + $0x20] sm:$0xff]  ;;  %v39_v25 = vld [vmem:[%s679_s3 + $0x18] sm:$0xff] }
  0x13   :  { %424 = vmatpush3.xpose.msk.msra.mxu1 %vm174_vm1, %v30_v10  ;;  %390 = vmatprep.subr.mxu0 %v475_v2  ;;  %v22_v26 = vld [vmem:[%s678_s2 + $0x18] sm:$0xff]  ;;  %v38_v27 = vld [vmem:[%s679_s3 + $0x10] sm:$0xff]  ;;  %v37_v29 = vld [vmem:[%s679_s3 + $0x8] sm:$0xff] }
  0x14   :  { %425 = vmatprep.subr.mxu1 %v475_v2  ;;  %v21_v28 = vld [vmem:[%s678_s2 + $0x10] sm:$0xff]  ;;  %v20_v30 = vld [vmem:[%s678_s2 + $0x8] sm:$0xff]  ;;  %v36_v31 = vld [vmem:[%s679_s3] sm:$0xff]  ;;  %s477_s3 = smov [#allocation2]  }
  0x15   :  { %v19_v32 = vld [vmem:[%s678_s2] sm:$0xff]  ;;  %s304_s2 = sshll.u32 %s477_s3, 4  ;;  %s305_s2 = int_to_ptr.vmem [resolvable:$true] %s304_s2 }
  0x16   :  { %391 = vmatpush3.xpose.msk.msra.mxu0 %vm52_vm0, %v46_v11  ;;  %v35_v33 = vld [vmem:[%s677_s1] sm:$0xff]  ;;  %s453_s5 = scalar_lea.vmem %s305_s2, 128  ;;  %p458_p1 = scmp.lt.s32.totalorder %s305_s2, %s305_s2 }
  0x17   :  { %426 = vmatpush3.xpose.msk.msra.mxu1 %vm174_vm1, %v29_v12  ;;  %392 = vmatprep.subr.mxu0 %v475_v2  ;;  %v18_v34 = vld [vmem:[%s676_s0] sm:$0xff]  ;;  %p454_p0 = scmp.ne.s32.totalorder %s305_s2, %s453_s5  ;;  %p459_p2 = scmp.lt.s32.totalorder %s453_s5, %s453_s5 }
  0x18   :  { %427 = vmatprep.subr.mxu1 %v475_v2 }
  0x19   :  { %p460_p3 = por %p459_p2, %p458_p1 }
  0x1a   :  { %393 = vmatpush3.xpose.msk.msra.mxu0 %vm52_vm0, %v45_v13 }
  0x1b   :  { %428 = vmatpush3.xpose.msk.msra.mxu1 %vm174_vm1, %v28_v14  ;;  %394 = vmatprep.subr.mxu0 %v475_v2  ;;  %p461_p4 = pnand %p460_p3, %p454_p0 }
  0x1c   :  { %429 = vmatprep.subr.mxu1 %v475_v2 }
  0x1e   :  { %395 = vmatpush3.xpose.msk.msra.mxu0 %vm52_vm0, %v44_v15 }
  0x1f   :  { %430 = vmatpush3.xpose.msk.msra.mxu1 %vm174_vm1, %v27_v16  ;;  %396 = vmatprep.subr.mxu0 %v475_v2 }
  0x20   :  { %431 = vmatprep.subr.mxu1 %v475_v2 }
  0x22   :  { %397 = vmatpush3.xpose.msk.msra.mxu0 %vm52_vm0, %v43_v17 }
  0x23   :  { %432 = vmatpush3.xpose.msk.msra.mxu1 %vm174_vm1, %v26_v18  ;;  %398 = vmatprep.subr.mxu0 %v475_v2 }
  0x24   :  { %433 = vmatprep.subr.mxu1 %v475_v2 }
  0x26   :  { %399 = vmatpush3.xpose.msk.msra.mxu0 %vm52_vm0, %v42_v19 }
  0x27   :  { %434 = vmatpush3.xpose.msk.msra.mxu1 %vm174_vm1, %v25_v20  ;;  %400 = vmatprep.subr.mxu0 %v475_v2 }
  0x28   :  { %435 = vmatprep.subr.mxu1 %v475_v2 }
  0x2a   :  { %401 = vmatpush3.xpose.msk.msra.mxu0 %vm52_vm0, %v41_v21 }
  0x2b   :  { %436 = vmatpush3.xpose.msk.msra.mxu1 %vm174_vm1, %v24_v22  ;;  %402 = vmatprep.subr.mxu0 %v475_v2 }
  0x2c   :  { %437 = vmatprep.subr.mxu1 %v475_v2 }
  0x2e   :  { %403 = vmatpush3.xpose.msk.msra.mxu0 %vm52_vm0, %v40_v23 }
  0x2f   :  { %438 = vmatpush3.xpose.msk.msra.mxu1 %vm174_vm1, %v23_v24  ;;  %404 = vmatprep.subr.mxu0 %v475_v2 }
  0x30   :  { %439 = vmatprep.subr.mxu1 %v475_v2 }
  0x32   :  { %405 = vmatpush3.xpose.msk.msra.mxu0 %vm52_vm0, %v39_v25 }
  0x33   :  { %440 = vmatpush3.xpose.msk.msra.mxu1 %vm174_vm1, %v22_v26  ;;  %406 = vmatprep.subr.mxu0 %v475_v2 }
  0x34   :  { %441 = vmatprep.subr.mxu1 %v475_v2 }
  0x36   :  { %407 = vmatpush3.xpose.msk.msra.mxu0 %vm52_vm0, %v38_v27 }
  0x37   :  { %442 = vmatpush3.xpose.msk.msra.mxu1 %vm174_vm1, %v21_v28  ;;  %408 = vmatprep.subr.mxu0 %v475_v2 }
  0x38   :  { %443 = vmatprep.subr.mxu1 %v475_v2 }
  0x3a   :  { %409 = vmatpush3.xpose.msk.msra.mxu0 %vm52_vm0, %v37_v29 }
  0x3b   :  { %444 = vmatpush3.xpose.msk.msra.mxu1 %vm174_vm1, %v20_v30  ;;  %410 = vmatprep.subr.mxu0 %v475_v2 }
  0x3c   :  { %445 = vmatprep.subr.mxu1 %v475_v2 }
  0x3e   :  { %411 = vmatpush3.xpose.msk.msra.mxu0 %vm52_vm0, %v36_v31 }
  0x3f   :  { %446 = vmatpush3.xpose.msk.msra.mxu1 %vm174_vm1, %v19_v32 }
  0x41   :  { %413 = vmatmul.mubr.msk.f32.vlgmr.msra.gmra.mxu0 %vm52_vm0, %v35_v33 }
  0x42   :  { %448 = vmatmul.mubr.msk.f32.vlgmr.msra.gmra.mxu1 %vm174_vm1, %v18_v34 }
 0x101   :  { %v170_v35 = vpop.f32.mrf.mxu0 }
 0x102   :  { %v292_v36 = vpop.f32.mrf.mxu1 }
 0x103   :  { %v293_v37 = vadd.f32 %v292_v36, %v170_v35  ;;  %v414_v38 = vpop.f32.mrf.mxu0 }
 0x104   :  { %v449_v39 = vpop.f32.mrf.mxu1 }
 0x105   :  { %v296_v40 = vmax.f32 %v293_v37, 0.0 }
 0x107   :  { %297 = vst [vmem:[#allocation2] sm:$0xff] %v296_v40 }
 0x108   :  { %464 = shalt.err (!%p461_p4)
}
 0x109   :  { %307 = dma.vmem_to_hbm [thread:$0]  %s305_s2, 128, %s680_s4, [#allocation3]  }
 0x10a   :  { %473 = dma.done.wait [#allocation3], 128  }
 0x10b   :  { %474 = vsyncadd [#allocation3], 4294967168 }
 0x10c   :  { %311 = vsyncpa [#allocation3], 1 }

</bundles_post_ra>
